<compile_context>
chip_gen: v5e
topology: v5e:2x2
jax: 0.10.0
libtpu: 0.0.40
codegen_flags: <defaults>
</compile_context>

<pallas_src>
import functools

import jax
import jax.numpy as jnp
import numpy as np
from jax.experimental import pallas as pl
from jax.experimental.pallas import tpu as pltpu


def _round_up(x: int, m: int) -> int:
    return (x + m - 1) // m * m


def _largest_divisor_leq(n: int, cap: int) -> int:
    cap = max(1, min(n, cap))
    for d in range(cap, 0, -1):
        if n % d == 0:
            return d
    return 1


def _dft_tables(n: int, n_pad: int):
    """cos/sin DFT tables of logical size (n, n), zero-padded to (n_pad, n_pad)."""
    idx = np.arange(n, dtype=np.float64)          # float64 angles: no precision loss
    ang = 2.0 * np.pi * np.outer(idx, idx) / float(n)
    cos = np.zeros((n_pad, n_pad), dtype=np.float32)
    sin = np.zeros((n_pad, n_pad), dtype=np.float32)
    cos[:n, :n] = np.cos(ang)
    sin[:n, :n] = np.sin(ang)
    return cos, sin


def _fourier_kernel(x_ref, tab1_ref, cl_ref, sl_ref, o_ref, acc_ref, *, tb, l_pad, tn):
    # x_ref:    (TB, L_pad, TK)        stage-1 LHS tile (TB batches packed into M)
    # tab1_ref: (TK, 2*TN)             [C_D | -S_D] column tile (sign pre-folded)
    # cl/sl:    (L_pad, L_pad)         seq-dim DFT tables (constant index -> 1 fetch)
    # o_ref:    (TB, L_pad, TN)
    # acc_ref:  (TB, L_pad, 2*TN) f32  stage-1 accumulator across the k axis
    k = pl.program_id(2)

    @pl.when(k == 0)
    def _init():
        acc_ref[...] = jnp.zeros_like(acc_ref)

    # Stage 1 (hidden-dim DFT), real & imag fused into one MXU dot:
    #   (TB*L_pad, TK) @ (TK, 2*TN) -> (TB*L_pad, 2*TN), f32 accumulation.
    x = x_ref[...].reshape(tb * l_pad, x_ref.shape[2])
    part = jnp.dot(x, tab1_ref[...], preferred_element_type=jnp.float32)
    acc_ref[...] += part.reshape(tb, l_pad, 2 * tn)

    # Stage 2 (seq-dim DFT) once the contraction over D is complete.
    @pl.when(k == pl.num_programs(2) - 1)
    def _finalize():
        s2_dtype = cl_ref.dtype
        for t in range(tb):                       # tb is a small static int
            y = acc_ref[t]                        # (L_pad, 2*TN) f32
            y_re = y[:, :tn].astype(s2_dtype)
            y_im = y[:, tn:].astype(s2_dtype)
            out_t = jnp.dot(cl_ref[...], y_re, preferred_element_type=jnp.float32)
            out_t = out_t + jnp.dot(sl_ref[...], y_im, preferred_element_type=jnp.float32)
            o_ref[t] = out_t.astype(o_ref.dtype)


def _table_spec(shape, index_map, single_buffer):
    if single_buffer:
        # Constant index map -> fetched once; single-buffer to halve its VMEM.
        return pl.BlockSpec(shape, index_map, pipeline_mode=pl.Buffered(1))
    return pl.BlockSpec(shape, index_map)


@functools.lru_cache(maxsize=None)
def _build_fourier_call(B, L, D, x_dtype_name, mm_dtype_name, s2_dtype_name,
                        single_buffer_tables):
    out_dtype = jnp.dtype(x_dtype_name)
    mm_dtype = jnp.dtype(mm_dtype_name)
    s2_dtype = jnp.dtype(s2_dtype_name)

    sublane = max(8, 32 // mm_dtype.itemsize)     # 8 for f32, 16 for bf16
    L_pad = _round_up(L, sublane)
    D_pad = _round_up(D, 128)

    tn = 256 if D_pad % 256 == 0 else 128         # output tile (lane-dense)
    tk = 512 if D_pad % 512 == 0 else (256 if D_pad % 256 == 0 else 128)
    J = D_pad // tn
    K = D_pad // tk

    # Pack TB batches into the MXU M dimension (small-L occupancy; also divides
    # the number of times the stage-1 tables are re-streamed from HBM by TB).
    tb = _largest_divisor_leq(B, max(1, 256 // L_pad))
    B_blocks = B // tb

    # DFT tables.  Stage-1 table interleaves [C_D | -S_D] per TN-wide column
    # block so one (TK, 2*TN) tile feeds the fused stage-1 dot.
    cd, sd = _dft_tables(D, D_pad)
    cl_np, sl_np = _dft_tables(L, L_pad)
    tab1_np = np.concatenate(
        [cd.reshape(D_pad, J, tn), (-sd).reshape(D_pad, J, tn)], axis=2
    ).reshape(D_pad, 2 * D_pad)
    tab1 = jnp.asarray(tab1_np, mm_dtype)
    cl = jnp.asarray(cl_np, s2_dtype)
    sl = jnp.asarray(sl_np, s2_dtype)

    # Explicit scoped-VMEM limit from the actual footprint (+ headroom).
    table_bufs = 1 if single_buffer_tables else 2
    vmem_bytes = (
        2 * tb * L_pad * tk * mm_dtype.itemsize                 # x (double-buffered)
        + 2 * tk * 2 * tn * mm_dtype.itemsize                   # [C_D | -S_D] tile
        + table_bufs * 2 * L_pad * L_pad * s2_dtype.itemsize    # C_L, S_L
        + 2 * tb * L_pad * tn * out_dtype.itemsize              # out tile
        + tb * L_pad * 2 * tn * 4                               # f32 accumulator
    )
    vmem_limit = int(min(max(int(vmem_bytes * 1.5) + (4 << 20), 32 << 20), 100 << 20))

    flops = 4 * B * L_pad * D_pad * (D_pad + L_pad)
    bytes_accessed = int(
        J * B * L_pad * D_pad * mm_dtype.itemsize               # x re-read per j tile
        + B_blocks * 2 * D_pad * D_pad * mm_dtype.itemsize      # stage-1 table per batch block
        + 2 * L_pad * L_pad * s2_dtype.itemsize                 # C_L, S_L streamed once
        + B * L_pad * D_pad * out_dtype.itemsize                # output
    )

    kernel = functools.partial(_fourier_kernel, tb=tb, l_pad=L_pad, tn=tn)

    call = pl.pallas_call(
        kernel,
        out_shape=jax.ShapeDtypeStruct((B, L_pad, D_pad), out_dtype),
        grid_spec=pltpu.PrefetchScalarGridSpec(
            num_scalar_prefetch=0,
            grid=(B_blocks, J, K),
            in_specs=[
                pl.BlockSpec((tb, L_pad, tk), lambda b, j, k: (b, 0, k)),    # x
                pl.BlockSpec((tk, 2 * tn), lambda b, j, k: (k, j)),          # [C_D|-S_D]
                _table_spec((L_pad, L_pad), lambda b, j, k: (0, 0), single_buffer_tables),
                _table_spec((L_pad, L_pad), lambda b, j, k: (0, 0), single_buffer_tables),
            ],
            out_specs=pl.BlockSpec((tb, L_pad, tn), lambda b, j, k: (b, 0, j)),
            scratch_shapes=[pltpu.VMEM((tb, L_pad, 2 * tn), jnp.float32)],
        ),
        compiler_params=pltpu.CompilerParams(
            dimension_semantics=("parallel", "parallel", "arbitrary"),
            vmem_limit_bytes=vmem_limit),
        cost_estimate=pl.CostEstimate(
            flops=flops, transcendentals=0, bytes_accessed=bytes_accessed),
    )

    @jax.jit
    def run(x):
        x_p = x
        if (L_pad, D_pad) != (L, D):
            x_p = jnp.pad(x, ((0, 0), (0, L_pad - L), (0, D_pad - D)))
        out = call(x_p.astype(mm_dtype), tab1, cl, sl)
        if (L_pad, D_pad) != (L, D):
            out = out[:, :L, :D]
        return out

    return run


_BUFFERED_TABLES_OK = True   # flips to False if this Pallas build rejects pl.Buffered(1)


def fourier_layer(x, matmul_dtype=jnp.float32, stage2_dtype=jnp.float32):
    """real(fft(fft(x, axis=2), axis=1)) for real-valued x of shape (B, L, D)."""
    global _BUFFERED_TABLES_OK
    B, L, D = x.shape
    key = (B, L, D, jnp.dtype(x.dtype).name, jnp.dtype(matmul_dtype).name,
           jnp.dtype(stage2_dtype).name)
    if _BUFFERED_TABLES_OK:
        try:
            return _build_fourier_call(*key, True)(x)
        except Exception:
            # pipeline_mode=pl.Buffered(1) unsupported here -> double-buffered tables.
            _BUFFERED_TABLES_OK = False
    return _build_fourier_call(*key, False)(x)


if __name__ == "__main__":
    key = jax.random.PRNGKey(0)
    k1, k2 = jax.random.split(key)

    def reference(x):
        return np.asarray(jnp.real(
            jnp.fft.fft(jnp.fft.fft(x.astype(jnp.complex64), axis=2), axis=1)))

    # Case 1: small shapes from the module spec (single tile, batch-packed).
    B, L, D = 2, 8, 32
    x1 = jax.random.normal(k1, (B, L, D), dtype=jnp.float32)
    out1 = jax.block_until_ready(fourier_layer(x1))
    assert out1.shape == (B, L, D) and out1.dtype == jnp.float32
    np.testing.assert_allclose(np.asarray(out1), reference(x1), rtol=1e-4, atol=1e-3)

    # Case 2: non-aligned shapes exercising multi-tile j/k grid axes, padding and
    # the K-axis accumulation (L_pad=24, D_pad=640 -> TN=TK=128, J=K=5, TB=3).
    B2, L2, D2 = 3, 20, 520
    x2 = jax.random.normal(k2, (B2, L2, D2), dtype=jnp.float32)
    out2 = jax.block_until_ready(fourier_layer(x2))
    assert out2.shape == (B2, L2, D2) and out2.dtype == jnp.float32
    np.testing.assert_allclose(np.asarray(out2), reference(x2), rtol=1e-3, atol=1e-2)

    # Case 3: bf16 MXU operands for both stages (f32 accumulation everywhere).
    # Loose tolerance by nature of bf16; tight correctness is covered by the f32 cases.
    out3 = jax.block_until_ready(
        fourier_layer(x1, matmul_dtype=jnp.bfloat16, stage2_dtype=jnp.bfloat16))
    assert out3.shape == (B, L, D) and out3.dtype == jnp.float32
    np.testing.assert_allclose(np.asarray(out3), reference(x1), rtol=5e-2, atol=1.0)

    print("KERNEL_OK")
</pallas_src>

<mosaic_0001>
module attributes {stable_mosaic.version = 11 : i64} {
  func.func @_fourier_kernel(%arg0: i32, %arg1: i32, %arg2: i32, %arg3: memref<2x8x128xf32, #tpu.memory_space<vmem>>, %arg4: memref<128x256xf32, #tpu.memory_space<vmem>>, %arg5: memref<8x8xf32, #tpu.memory_space<vmem>>, %arg6: memref<8x8xf32, #tpu.memory_space<vmem>>, %arg7: memref<2x8x128xf32, #tpu.memory_space<vmem>>, %arg8: memref<2x8x256xf32, #tpu.memory_space<vmem>>) attributes {dimension_semantics = [#tpu.dimension_semantics<parallel>, #tpu.dimension_semantics<parallel>, #tpu.dimension_semantics<arbitrary>], iteration_bounds = array<i64: 1, 1, 1>, scalar_prefetch = 0 : i64, scratch_operands = 1 : i64, tpu.core_type = #tpu.core_type<tc>, window_params = [{transform_indices = @transform_0, window_bounds = array<i64: 2, 8, 128>}, {transform_indices = @transform_1, window_bounds = array<i64: 128, 256>}, {pipeline_mode = #tpu.pipeline_mode<synchronous>, transform_indices = @transform_2, window_bounds = array<i64: 8, 8>}, {pipeline_mode = #tpu.pipeline_mode<synchronous>, transform_indices = @transform_3, window_bounds = array<i64: 8, 8>}, {transform_indices = @transform_4, window_bounds = array<i64: 2, 8, 128>}]} {
    %c0_i32 = arith.constant 0 : i32
    %0 = arith.cmpi eq, %arg2, %c0_i32 : i32
    %1 = arith.extui %0 : i1 to i32
    %c0_i32_0 = arith.constant 0 : i32
    %2 = arith.cmpi ne, %1, %c0_i32_0 : i32
    scf.if %2 {
      %cst_13 = arith.constant 0.000000e+00 : f32
      %14 = vector.broadcast %cst_13 : f32 to vector<2x8x256xf32>
      %c0_14 = arith.constant 0 : index
      %c0_15 = arith.constant 0 : index
      %c0_16 = arith.constant 0 : index
      %15 = vector.load %arg8[%c0_14, %c0_15, %c0_16] : memref<2x8x256xf32, #tpu.memory_space<vmem>>, vector<2x8x256xf32>
      tpu.vector_store %arg8[%c0_14, %c0_15, %c0_16], %14 {strides = array<i32>} : memref<2x8x256xf32, #tpu.memory_space<vmem>>, vector<2x8x256xf32>,
    } else {
    }
    %c0 = arith.constant 0 : index
    %c0_1 = arith.constant 0 : index
    %c0_2 = arith.constant 0 : index
    %3 = vector.load %arg3[%c0, %c0_1, %c0_2] : memref<2x8x128xf32, #tpu.memory_space<vmem>>, vector<2x8x128xf32>
    %4 = vector.shape_cast %3 : vector<2x8x128xf32> to vector<16x128xf32>
    %c0_3 = arith.constant 0 : index
    %c0_4 = arith.constant 0 : index
    %5 = vector.load %arg4[%c0_3, %c0_4] : memref<128x256xf32, #tpu.memory_space<vmem>>, vector<128x256xf32>
    %cst = arith.constant dense<0.000000e+00> : vector<16x256xf32>
    %6 = tpu.matmul %4, %5, %cst {dimension_numbers = #tpu.dot_dimension_numbers<[1], [0], [0], [1], [0, 0, 1, 1], [], []>} : vector<16x128xf32>, vector<128x256xf32>, vector<16x256xf32> -> vector<16x256xf32>
    %c0_5 = arith.constant 0 : index
    %c0_6 = arith.constant 0 : index
    %c0_7 = arith.constant 0 : index
    %7 = vector.load %arg8[%c0_5, %c0_6, %c0_7] : memref<2x8x256xf32, #tpu.memory_space<vmem>>, vector<2x8x256xf32>
    %8 = vector.shape_cast %6 : vector<16x256xf32> to vector<2x8x256xf32>
    %9 = arith.addf %7, %8 : vector<2x8x256xf32>
    %c0_8 = arith.constant 0 : index
    %c0_9 = arith.constant 0 : index
    %c0_10 = arith.constant 0 : index
    %10 = vector.load %arg8[%c0_8, %c0_9, %c0_10] : memref<2x8x256xf32, #tpu.memory_space<vmem>>, vector<2x8x256xf32>
    tpu.vector_store %arg8[%c0_8, %c0_9, %c0_10], %9 {strides = array<i32>} : memref<2x8x256xf32, #tpu.memory_space<vmem>>, vector<2x8x256xf32>,
    %c0_i32_11 = arith.constant 0 : i32
    %11 = arith.cmpi eq, %arg2, %c0_i32_11 : i32
    %12 = arith.extui %11 : i1 to i32
    %c0_i32_12 = arith.constant 0 : i32
    %13 = arith.cmpi ne, %12, %c0_i32_12 : i32
    scf.if %13 {
      %c0_13 = arith.constant 0 : index
      %c0_14 = arith.constant 0 : index
      %c0_15 = arith.constant 0 : index
      %14 = vector.load %arg8[%c0_13, %c0_14, %c0_15] : memref<2x8x256xf32, #tpu.memory_space<vmem>>, vector<1x8x256xf32>
      %15 = vector.shape_cast %14 : vector<1x8x256xf32> to vector<8x256xf32>
      %16 = vector.extract_strided_slice %15 {offsets = [0, 0], sizes = [8, 128], strides = [1, 1]} : vector<8x256xf32> to vector<8x128xf32>
      %17 = vector.extract_strided_slice %15 {offsets = [0, 128], sizes = [8, 128], strides = [1, 1]} : vector<8x256xf32> to vector<8x128xf32>
      %c0_16 = arith.constant 0 : index
      %c0_17 = arith.constant 0 : index
      %18 = vector.load %arg5[%c0_16, %c0_17] : memref<8x8xf32, #tpu.memory_space<vmem>>, vector<8x8xf32>
      %cst_18 = arith.constant dense<0.000000e+00> : vector<8x128xf32>
      %19 = tpu.matmul %18, %16, %cst_18 {dimension_numbers = #tpu.dot_dimension_numbers<[1], [0], [0], [1], [0, 0, 1, 1], [], []>} : vector<8x8xf32>, vector<8x128xf32>, vector<8x128xf32> -> vector<8x128xf32>
      %c0_19 = arith.constant 0 : index
      %c0_20 = arith.constant 0 : index
      %20 = vector.load %arg6[%c0_19, %c0_20] : memref<8x8xf32, #tpu.memory_space<vmem>>, vector<8x8xf32>
      %cst_21 = arith.constant dense<0.000000e+00> : vector<8x128xf32>
      %21 = tpu.matmul %20, %17, %cst_21 {dimension_numbers = #tpu.dot_dimension_numbers<[1], [0], [0], [1], [0, 0, 1, 1], [], []>} : vector<8x8xf32>, vector<8x128xf32>, vector<8x128xf32> -> vector<8x128xf32>
      %22 = arith.addf %19, %21 : vector<8x128xf32>
      %c0_22 = arith.constant 0 : index
      %c0_23 = arith.constant 0 : index
      %c0_24 = arith.constant 0 : index
      %23 = vector.load %arg7[%c0_22, %c0_23, %c0_24] : memref<2x8x128xf32, #tpu.memory_space<vmem>>, vector<1x8x128xf32>
      %24 = vector.shape_cast %23 : vector<1x8x128xf32> to vector<8x128xf32>
      %25 = vector.shape_cast %22 : vector<8x128xf32> to vector<1x8x128xf32>
      tpu.vector_store %arg7[%c0_22, %c0_23, %c0_24], %25 {strides = array<i32>} : memref<2x8x128xf32, #tpu.memory_space<vmem>>, vector<1x8x128xf32>,
      %c1 = arith.constant 1 : index
      %c0_25 = arith.constant 0 : index
      %c0_26 = arith.constant 0 : index
      %26 = vector.load %arg8[%c1, %c0_25, %c0_26] : memref<2x8x256xf32, #tpu.memory_space<vmem>>, vector<1x8x256xf32>
      %27 = vector.shape_cast %26 : vector<1x8x256xf32> to vector<8x256xf32>
      %28 = vector.extract_strided_slice %27 {offsets = [0, 0], sizes = [8, 128], strides = [1, 1]} : vector<8x256xf32> to vector<8x128xf32>
      %29 = vector.extract_strided_slice %27 {offsets = [0, 128], sizes = [8, 128], strides = [1, 1]} : vector<8x256xf32> to vector<8x128xf32>
      %c0_27 = arith.constant 0 : index
      %c0_28 = arith.constant 0 : index
      %30 = vector.load %arg5[%c0_27, %c0_28] : memref<8x8xf32, #tpu.memory_space<vmem>>, vector<8x8xf32>
      %cst_29 = arith.constant dense<0.000000e+00> : vector<8x128xf32>
      %31 = tpu.matmul %30, %28, %cst_29 {dimension_numbers = #tpu.dot_dimension_numbers<[1], [0], [0], [1], [0, 0, 1, 1], [], []>} : vector<8x8xf32>, vector<8x128xf32>, vector<8x128xf32> -> vector<8x128xf32>
      %c0_30 = arith.constant 0 : index
      %c0_31 = arith.constant 0 : index
      %32 = vector.load %arg6[%c0_30, %c0_31] : memref<8x8xf32, #tpu.memory_space<vmem>>, vector<8x8xf32>
      %cst_32 = arith.constant dense<0.000000e+00> : vector<8x128xf32>
      %33 = tpu.matmul %32, %29, %cst_32 {dimension_numbers = #tpu.dot_dimension_numbers<[1], [0], [0], [1], [0, 0, 1, 1], [], []>} : vector<8x8xf32>, vector<8x128xf32>, vector<8x128xf32> -> vector<8x128xf32>
      %34 = arith.addf %31, %33 : vector<8x128xf32>
      %c1_33 = arith.constant 1 : index
      %c0_34 = arith.constant 0 : index
      %c0_35 = arith.constant 0 : index
      %35 = vector.load %arg7[%c1_33, %c0_34, %c0_35] : memref<2x8x128xf32, #tpu.memory_space<vmem>>, vector<1x8x128xf32>
      %36 = vector.shape_cast %35 : vector<1x8x128xf32> to vector<8x128xf32>
      %37 = vector.shape_cast %34 : vector<8x128xf32> to vector<1x8x128xf32>
      tpu.vector_store %arg7[%c1_33, %c0_34, %c0_35], %37 {strides = array<i32>} : memref<2x8x128xf32, #tpu.memory_space<vmem>>, vector<1x8x128xf32>,
    } else {
    }
    return
  }
  func.func @transform_0(%arg0: i32, %arg1: i32, %arg2: i32) -> (i32, i32, i32) {
    %c0_i32 = arith.constant 0 : i32
    %c0_i32_0 = arith.constant 0 : i32
    return %arg0, %c0_i32, %arg2 : i32, i32, i32
  }
  func.func @transform_1(%arg0: i32, %arg1: i32, %arg2: i32) -> (i32, i32) {
    %c0_i32 = arith.constant 0 : i32
    return %arg2, %arg1 : i32, i32
  }
  func.func @transform_2(%arg0: i32, %arg1: i32, %arg2: i32) -> (i32, i32) {
    %c0_i32 = arith.constant 0 : i32
    %c0_i32_0 = arith.constant 0 : i32
    %c0_i32_1 = arith.constant 0 : i32
    return %c0_i32, %c0_i32_0 : i32, i32
  }
  func.func @transform_3(%arg0: i32, %arg1: i32, %arg2: i32) -> (i32, i32) {
    %c0_i32 = arith.constant 0 : i32
    %c0_i32_0 = arith.constant 0 : i32
    %c0_i32_1 = arith.constant 0 : i32
    return %c0_i32, %c0_i32_0 : i32, i32
  }
  func.func @transform_4(%arg0: i32, %arg1: i32, %arg2: i32) -> (i32, i32, i32) {
    %c0_i32 = arith.constant 0 : i32
    %c0_i32_0 = arith.constant 0 : i32
    return %arg0, %c0_i32, %arg1 : i32, i32, i32
  }
}

module attributes {stable_mosaic.version = 11 : i64} {
  func.func @_fourier_kernel(%arg0: i32, %arg1: i32, %arg2: i32, %arg3: memref<2x8x128xf32, #tpu.memory_space<vmem>>, %arg4: memref<128x256xf32, #tpu.memory_space<vmem>>, %arg5: memref<8x8xf32, #tpu.memory_space<vmem>>, %arg6: memref<8x8xf32, #tpu.memory_space<vmem>>, %arg7: memref<2x8x128xf32, #tpu.memory_space<vmem>>, %arg8: memref<2x8x256xf32, #tpu.memory_space<vmem>>) attributes {dimension_semantics = [#tpu.dimension_semantics<parallel>, #tpu.dimension_semantics<parallel>, #tpu.dimension_semantics<arbitrary>], iteration_bounds = array<i64: 1, 1, 1>, scalar_prefetch = 0 : i64, scratch_operands = 1 : i64, tpu.core_type = #tpu.core_type<tc>, window_params = [{transform_indices = @transform_0, window_bounds = array<i64: 2, 8, 128>}, {transform_indices = @transform_1, window_bounds = array<i64: 128, 256>}, {pipeline_mode = #tpu.pipeline_mode<synchronous>, transform_indices = @transform_2, window_bounds = array<i64: 8, 8>}, {pipeline_mode = #tpu.pipeline_mode<synchronous>, transform_indices = @transform_3, window_bounds = array<i64: 8, 8>}, {transform_indices = @transform_4, window_bounds = array<i64: 2, 8, 128>}]} {
    %c0_i32 = arith.constant 0 : i32
    %0 = arith.cmpi eq, %arg2, %c0_i32 : i32
    %1 = arith.extui %0 : i1 to i32
    %c0_i32_0 = arith.constant 0 : i32
    %2 = arith.cmpi ne, %1, %c0_i32_0 : i32
    scf.if %2 {
      %cst_13 = arith.constant 0.000000e+00 : f32
      %14 = vector.broadcast %cst_13 : f32 to vector<2x8x256xf32>
      %c0_14 = arith.constant 0 : index
      %c0_15 = arith.constant 0 : index
      %c0_16 = arith.constant 0 : index
      %15 = vector.load %arg8[%c0_14, %c0_15, %c0_16] : memref<2x8x256xf32, #tpu.memory_space<vmem>>, vector<2x8x256xf32>
      tpu.vector_store %arg8[%c0_14, %c0_15, %c0_16], %14 {strides = array<i32>} : memref<2x8x256xf32, #tpu.memory_space<vmem>>, vector<2x8x256xf32>,
    } else {
    }
    %c0 = arith.constant 0 : index
    %c0_1 = arith.constant 0 : index
    %c0_2 = arith.constant 0 : index
    %3 = vector.load %arg3[%c0, %c0_1, %c0_2] : memref<2x8x128xf32, #tpu.memory_space<vmem>>, vector<2x8x128xf32>
    %4 = vector.shape_cast %3 : vector<2x8x128xf32> to vector<16x128xf32>
    %c0_3 = arith.constant 0 : index
    %c0_4 = arith.constant 0 : index
    %5 = vector.load %arg4[%c0_3, %c0_4] : memref<128x256xf32, #tpu.memory_space<vmem>>, vector<128x256xf32>
    %cst = arith.constant dense<0.000000e+00> : vector<16x256xf32>
    %6 = tpu.matmul %4, %5, %cst {dimension_numbers = #tpu.dot_dimension_numbers<[1], [0], [0], [1], [0, 0, 1, 1], [], []>} : vector<16x128xf32>, vector<128x256xf32>, vector<16x256xf32> -> vector<16x256xf32>
    %c0_5 = arith.constant 0 : index
    %c0_6 = arith.constant 0 : index
    %c0_7 = arith.constant 0 : index
    %7 = vector.load %arg8[%c0_5, %c0_6, %c0_7] : memref<2x8x256xf32, #tpu.memory_space<vmem>>, vector<2x8x256xf32>
    %8 = vector.shape_cast %6 : vector<16x256xf32> to vector<2x8x256xf32>
    %9 = arith.addf %7, %8 : vector<2x8x256xf32>
    %c0_8 = arith.constant 0 : index
    %c0_9 = arith.constant 0 : index
    %c0_10 = arith.constant 0 : index
    %10 = vector.load %arg8[%c0_8, %c0_9, %c0_10] : memref<2x8x256xf32, #tpu.memory_space<vmem>>, vector<2x8x256xf32>
    tpu.vector_store %arg8[%c0_8, %c0_9, %c0_10], %9 {strides = array<i32>} : memref<2x8x256xf32, #tpu.memory_space<vmem>>, vector<2x8x256xf32>,
    %c0_i32_11 = arith.constant 0 : i32
    %11 = arith.cmpi eq, %arg2, %c0_i32_11 : i32
    %12 = arith.extui %11 : i1 to i32
    %c0_i32_12 = arith.constant 0 : i32
    %13 = arith.cmpi ne, %12, %c0_i32_12 : i32
    scf.if %13 {
      %c0_13 = arith.constant 0 : index
      %c0_14 = arith.constant 0 : index
      %c0_15 = arith.constant 0 : index
      %14 = vector.load %arg8[%c0_13, %c0_14, %c0_15] : memref<2x8x256xf32, #tpu.memory_space<vmem>>, vector<1x8x256xf32>
      %15 = vector.shape_cast %14 : vector<1x8x256xf32> to vector<8x256xf32>
      %16 = vector.extract_strided_slice %15 {offsets = [0, 0], sizes = [8, 128], strides = [1, 1]} : vector<8x256xf32> to vector<8x128xf32>
      %17 = vector.extract_strided_slice %15 {offsets = [0, 128], sizes = [8, 128], strides = [1, 1]} : vector<8x256xf32> to vector<8x128xf32>
      %c0_16 = arith.constant 0 : index
      %c0_17 = arith.constant 0 : index
      %18 = vector.load %arg5[%c0_16, %c0_17] : memref<8x8xf32, #tpu.memory_space<vmem>>, vector<8x8xf32>
      %cst_18 = arith.constant dense<0.000000e+00> : vector<8x128xf32>
      %19 = tpu.matmul %18, %16, %cst_18 {dimension_numbers = #tpu.dot_dimension_numbers<[1], [0], [0], [1], [0, 0, 1, 1], [], []>} : vector<8x8xf32>, vector<8x128xf32>, vector<8x128xf32> -> vector<8x128xf32>
      %c0_19 = arith.constant 0 : index
      %c0_20 = arith.constant 0 : index
      %20 = vector.load %arg6[%c0_19, %c0_20] : memref<8x8xf32, #tpu.memory_space<vmem>>, vector<8x8xf32>
      %cst_21 = arith.constant dense<0.000000e+00> : vector<8x128xf32>
      %21 = tpu.matmul %20, %17, %cst_21 {dimension_numbers = #tpu.dot_dimension_numbers<[1], [0], [0], [1], [0, 0, 1, 1], [], []>} : vector<8x8xf32>, vector<8x128xf32>, vector<8x128xf32> -> vector<8x128xf32>
      %22 = arith.addf %19, %21 : vector<8x128xf32>
      %c0_22 = arith.constant 0 : index
      %c0_23 = arith.constant 0 : index
      %c0_24 = arith.constant 0 : index
      %23 = vector.load %arg7[%c0_22, %c0_23, %c0_24] : memref<2x8x128xf32, #tpu.memory_space<vmem>>, vector<1x8x128xf32>
      %24 = vector.shape_cast %23 : vector<1x8x128xf32> to vector<8x128xf32>
      %25 = vector.shape_cast %22 : vector<8x128xf32> to vector<1x8x128xf32>
      tpu.vector_store %arg7[%c0_22, %c0_23, %c0_24], %25 {strides = array<i32>} : memref<2x8x128xf32, #tpu.memory_space<vmem>>, vector<1x8x128xf32>,
      %c1 = arith.constant 1 : index
      %c0_25 = arith.constant 0 : index
      %c0_26 = arith.constant 0 : index
      %26 = vector.load %arg8[%c1, %c0_25, %c0_26] : memref<2x8x256xf32, #tpu.memory_space<vmem>>, vector<1x8x256xf32>
      %27 = vector.shape_cast %26 : vector<1x8x256xf32> to vector<8x256xf32>
      %28 = vector.extract_strided_slice %27 {offsets = [0, 0], sizes = [8, 128], strides = [1, 1]} : vector<8x256xf32> to vector<8x128xf32>
      %29 = vector.extract_strided_slice %27 {offsets = [0, 128], sizes = [8, 128], strides = [1, 1]} : vector<8x256xf32> to vector<8x128xf32>
      %c0_27 = arith.constant 0 : index
      %c0_28 = arith.constant 0 : index
      %30 = vector.load %arg5[%c0_27, %c0_28] : memref<8x8xf32, #tpu.memory_space<vmem>>, vector<8x8xf32>
      %cst_29 = arith.constant dense<0.000000e+00> : vector<8x128xf32>
      %31 = tpu.matmul %30, %28, %cst_29 {dimension_numbers = #tpu.dot_dimension_numbers<[1], [0], [0], [1], [0, 0, 1, 1], [], []>} : vector<8x8xf32>, vector<8x128xf32>, vector<8x128xf32> -> vector<8x128xf32>
      %c0_30 = arith.constant 0 : index
      %c0_31 = arith.constant 0 : index
      %32 = vector.load %arg6[%c0_30, %c0_31] : memref<8x8xf32, #tpu.memory_space<vmem>>, vector<8x8xf32>
      %cst_32 = arith.constant dense<0.000000e+00> : vector<8x128xf32>
      %33 = tpu.matmul %32, %29, %cst_32 {dimension_numbers = #tpu.dot_dimension_numbers<[1], [0], [0], [1], [0, 0, 1, 1], [], []>} : vector<8x8xf32>, vector<8x128xf32>, vector<8x128xf32> -> vector<8x128xf32>
      %34 = arith.addf %31, %33 : vector<8x128xf32>
      %c1_33 = arith.constant 1 : index
      %c0_34 = arith.constant 0 : index
      %c0_35 = arith.constant 0 : index
      %35 = vector.load %arg7[%c1_33, %c0_34, %c0_35] : memref<2x8x128xf32, #tpu.memory_space<vmem>>, vector<1x8x128xf32>
      %36 = vector.shape_cast %35 : vector<1x8x128xf32> to vector<8x128xf32>
      %37 = vector.shape_cast %34 : vector<8x128xf32> to vector<1x8x128xf32>
      tpu.vector_store %arg7[%c1_33, %c0_34, %c0_35], %37 {strides = array<i32>} : memref<2x8x128xf32, #tpu.memory_space<vmem>>, vector<1x8x128xf32>,
    } else {
    }
    return
  }
  func.func @transform_0(%arg0: i32, %arg1: i32, %arg2: i32) -> (i32, i32, i32) {
    %c0_i32 = arith.constant 0 : i32
    %c0_i32_0 = arith.constant 0 : i32
    return %arg0, %c0_i32, %arg2 : i32, i32, i32
  }
  func.func @transform_1(%arg0: i32, %arg1: i32, %arg2: i32) -> (i32, i32) {
    %c0_i32 = arith.constant 0 : i32
    return %arg2, %arg1 : i32, i32
  }
  func.func @transform_2(%arg0: i32, %arg1: i32, %arg2: i32) -> (i32, i32) {
    %c0_i32 = arith.constant 0 : i32
    %c0_i32_0 = arith.constant 0 : i32
    %c0_i32_1 = arith.constant 0 : i32
    return %c0_i32, %c0_i32_0 : i32, i32
  }
  func.func @transform_3(%arg0: i32, %arg1: i32, %arg2: i32) -> (i32, i32) {
    %c0_i32 = arith.constant 0 : i32
    %c0_i32_0 = arith.constant 0 : i32
    %c0_i32_1 = arith.constant 0 : i32
    return %c0_i32, %c0_i32_0 : i32, i32
  }
  func.func @transform_4(%arg0: i32, %arg1: i32, %arg2: i32) -> (i32, i32, i32) {
    %c0_i32 = arith.constant 0 : i32
    %c0_i32_0 = arith.constant 0 : i32
    return %arg0, %c0_i32, %arg1 : i32, i32, i32
  }
}

</mosaic_0001>

<bundles_post_ra>
// kernel: run.1
= control target key start
LH: loop header
LB: loop body
LE: loop exit
PB: predicated region body
PF: predicated region fallthrough
CT: control target
= control target key end

     0   :  { %9 = vsyncpa [#allocation4], 0  ;;  %s372_s0 = inlined_call_operand.vmem [shape: f32[2,8,128], index: 0, kind: input, shape index: {}]   ;;  %s373_s1 = inlined_call_operand.hbm [shape: f32[128,256], index: 1, kind: input, shape index: {}]   ;;  %s374_s2 = inlined_call_operand.vmem [shape: f32[8,8], index: 2, kind: input, shape index: {}]   ;;  %s375_s3 = inlined_call_operand.vmem [shape: f32[8,8], index: 3, kind: input, shape index: {}]   ;;  %s376_s4 = inlined_call_operand.hbm [shape: f32[2,8,128], index: 4, kind: output, shape index: {}]  }
   0x1   :  { %10 = vsyncpa [#allocation5], 0  ;;  %s17_s17 = sshll.u32 %s373_s1, 4  ;;  %s323_s18 = smov [#allocation3]   ;;  %s18_s17 = int_to_ptr.hbm [resolvable:$true] %s17_s17 }
   0x2   :  { %s19_s19 = sshll.u32 %s323_s18, 4  ;;  %s324_s20 = smov 256   ;;  %s20_s19 = int_to_ptr.vmem [resolvable:$true] %s19_s19 }
   0x3   :  { %s325_s21 = smov 16  }
   0x4   :  { %25 = dma.hbm_to_vmem [thread:$0]  %s18_s17, 4096, %s20_s19, [#allocation4], %s324_s20, %s324_s20, %s325_s21  }
   0x5   :  { %319 = dma.done.wait [#allocation4], 4096  }
   0x6   :  { %320 = vsyncadd [#allocation4], 4294963200  ;;  %v74_v0 = vld [vmem:[#allocation3 + $0xf0] sm:$0xff]  ;;  %v75_v1 = vld [vmem:[#allocation3 + $0xf8] sm:$0xff]  ;;  %vm141_vm0 = vcmask 64512   ;;  %s248_s30 = sshll.u32 %s376_s4, 4  ;;  %s249_s30 = int_to_ptr.hbm [resolvable:$true] %s248_s30 }
   0x7   :  { %v72_v2 = vld [vmem:[#allocation3 + $0xe0] sm:$0xff]  ;;  %76 = vmatpush.msra.mxu0 %v74_v0  ;;  %99 = vmatpush.msra.mxu1 %v75_v1  ;;  %v73_v3 = vld [vmem:[#allocation3 + $0xe8] sm:$0xff]  ;;  %v70_v4 = vld [vmem:[#allocation3 + $0xd0] sm:$0xff]  ;;  %s327_s5 = smov 128   ;;  %s328_s6 = smov 8  }
   0x8   :  { %v71_v5 = vld [vmem:[#allocation3 + $0xd8] sm:$0xff]  ;;  %v68_v6 = vld [vmem:[#allocation3 + $0xc0] sm:$0xff]  ;;  %v69_v7 = vld [vmem:[#allocation3 + $0xc8] sm:$0xff] }
   0x9   :  { %77 = vmatpush.msra.mxu0 %v72_v2  ;;  %100 = vmatpush.msra.mxu1 %v73_v3  ;;  %v66_v8 = vld [vmem:[#allocation3 + $0xb0] sm:$0xff]  ;;  %v67_v9 = vld [vmem:[#allocation3 + $0xb8] sm:$0xff]  ;;  %v64_v10 = vld [vmem:[#allocation3 + $0xa0] sm:$0xff] }
   0xa   :  { %v65_v11 = vld [vmem:[#allocation3 + $0xa8] sm:$0xff]  ;;  %v62_v12 = vld [vmem:[#allocation3 + $0x90] sm:$0xff]  ;;  %v63_v13 = vld [vmem:[#allocation3 + $0x98] sm:$0xff] }
   0xb   :  { %78 = vmatpush.msra.mxu0 %v70_v4  ;;  %101 = vmatpush.msra.mxu1 %v71_v5  ;;  %v60_v14 = vld [vmem:[#allocation3 + $0x80] sm:$0xff]  ;;  %v61_v15 = vld [vmem:[#allocation3 + $0x88] sm:$0xff]  ;;  %v58_v16 = vld [vmem:[#allocation3 + $0x70] sm:$0xff] }
   0xc   :  { %v59_v17 = vld [vmem:[#allocation3 + $0x78] sm:$0xff]  ;;  %v56_v18 = vld [vmem:[#allocation3 + $0x60] sm:$0xff]  ;;  %v57_v19 = vld [vmem:[#allocation3 + $0x68] sm:$0xff] }
   0xd   :  { %79 = vmatpush.msra.mxu0 %v68_v6  ;;  %102 = vmatpush.msra.mxu1 %v69_v7  ;;  %v54_v20 = vld [vmem:[#allocation3 + $0x50] sm:$0xff]  ;;  %v55_v21 = vld [vmem:[#allocation3 + $0x58] sm:$0xff]  ;;  %v52_v22 = vld [vmem:[#allocation3 + $0x40] sm:$0xff] }
   0xe   :  { %v53_v23 = vld [vmem:[#allocation3 + $0x48] sm:$0xff]  ;;  %v50_v24 = vld [vmem:[#allocation3 + $0x30] sm:$0xff]  ;;  %v51_v25 = vld [vmem:[#allocation3 + $0x38] sm:$0xff] }
   0xf   :  { %80 = vmatpush.msra.mxu0 %v66_v8  ;;  %103 = vmatpush.msra.mxu1 %v67_v9  ;;  %v48_v26 = vld [vmem:[#allocation3 + $0x20] sm:$0xff]  ;;  %v49_v27 = vld [vmem:[#allocation3 + $0x28] sm:$0xff]  ;;  %v46_v28 = vld [vmem:[#allocation3 + $0x10] sm:$0xff] }
  0x10   :  { %v47_v29 = vld [vmem:[#allocation3 + $0x18] sm:$0xff]  ;;  %v44_v30 = vld [vmem:[#allocation3] sm:$0xff]  ;;  %v45_v31 = vld [vmem:[#allocation3 + $0x8] sm:$0xff] }
  0x11   :  { %81 = vmatpush.msra.mxu0 %v64_v10  ;;  %104 = vmatpush.msra.mxu1 %v65_v11  ;;  %v42_v32 = vld [vmem:[%s372_s0] sm:$0xff]  ;;  %v43_v33 = vld [vmem:[%s372_s0 + $0x8] sm:$0xff]  ;;  %s326_s0 = smov [#allocation6]  }
  0x12   :  { %v140_v34 = vld [vmem:[%s375_s3] sm:$0xff]  ;;  %s246_s3 = sshll.u32 %s326_s0, 4  ;;  %s247_s3 = int_to_ptr.vmem [resolvable:$true] %s246_s3 }
  0x13   :  { %82 = vmatpush.msra.mxu0 %v62_v12  ;;  %105 = vmatpush.msra.mxu1 %v63_v13  ;;  %v139_v35 = vld [vmem:[%s374_s2] sm:$0xff] }
  0x15   :  { %83 = vmatpush.msra.mxu0 %v60_v14  ;;  %106 = vmatpush.msra.mxu1 %v61_v15 }
  0x17   :  { %84 = vmatpush.msra.mxu0 %v58_v16  ;;  %107 = vmatpush.msra.mxu1 %v59_v17 }
  0x19   :  { %85 = vmatpush.msra.mxu0 %v56_v18  ;;  %108 = vmatpush.msra.mxu1 %v57_v19 }
  0x1b   :  { %86 = vmatpush.msra.mxu0 %v54_v20  ;;  %109 = vmatpush.msra.mxu1 %v55_v21 }
  0x1d   :  { %87 = vmatpush.msra.mxu0 %v52_v22  ;;  %110 = vmatpush.msra.mxu1 %v53_v23 }
  0x1f   :  { %88 = vmatpush.msra.mxu0 %v50_v24  ;;  %111 = vmatpush.msra.mxu1 %v51_v25 }
  0x21   :  { %89 = vmatpush.msra.mxu0 %v48_v26  ;;  %112 = vmatpush.msra.mxu1 %v49_v27 }
  0x23   :  { %90 = vmatpush.msra.mxu0 %v46_v28  ;;  %113 = vmatpush.msra.mxu1 %v47_v29 }
  0x25   :  { %91 = vmatpush.msra.mxu0 %v44_v30  ;;  %114 = vmatpush.msra.mxu1 %v45_v31 }
  0x26   :  { %92 = vmatmul.f32.vlgmr.msra.gmra.mxu0 %v42_v32  ;;  %115 = vmatmul.f32.vlgmr.msra.gmra.mxu1 %v42_v32 }
  0x2e   :  { %95 = vmatmul.f32.gmra.mxu0 %v43_v33  ;;  %118 = vmatmul.f32.gmra.mxu1 %v43_v33 }
  0xa3   :  { %v93_v36 = vpop.f32.mrf.mxu0  ;;  %v116_v37 = vpop.f32.mrf.mxu1 }
  0xa4   :  { %160 = vmatpush.msra.mxu2 %v116_v37  ;;  %183 = vmatpush.msra.mxu3 %v93_v36 }
  0xa5   :  { %261 = vmatmul.msk.f32.vlgmr.msra.gmra.mxu2 %vm141_vm0, %v140_v34  ;;  %262 = vmatmul.msk.f32.vlgmr.msra.gmra.mxu3 %vm141_vm0, %v139_v35 }
  0xab   :  { %v96_v38 = vpop.f32.mrf.mxu0  ;;  %v119_v39 = vpop.f32.mrf.mxu1 }
  0xac   :  { %212 = vmatpush.msrb.mxu2 %v119_v39  ;;  %235 = vmatpush.msrb.mxu3 %v96_v38 }
  0xad   :  { %263 = vmatmul.msk.f32.vlgmr.msrb.gmra.mxu2 %vm141_vm0, %v140_v34  ;;  %264 = vmatmul.msk.f32.vlgmr.msrb.gmra.mxu3 %vm141_vm0, %v139_v35 }
 0x128   :  { %v162_v40 = vpop.f32.mrf.mxu2  ;;  %v185_v41 = vpop.f32.mrf.mxu3 }
 0x129   :  { %v186_v42 = vadd.f32 %v185_v41, %v162_v40 }
 0x12b   :  { %188 = vst [vmem:[#allocation6] sm:$0xff] %v186_v42 }
 0x130   :  { %v214_v43 = vpop.f32.mrf.mxu2  ;;  %v237_v44 = vpop.f32.mrf.mxu3 }
 0x131   :  { %v238_v45 = vadd.f32 %v237_v44, %v214_v43 }
 0x133   :  { %241 = vst [vmem:[#allocation6 + $0x8] sm:$0xff] %v238_v45 }
 0x134   :  { %254 = dma.vmem_to_hbm [thread:$0]  %s247_s3, 256, %s249_s30, [#allocation5], %s327_s5, %s327_s5, %s328_s6  }
 0x135   :  { %321 = dma.done.wait [#allocation5], 256  }
 0x136   :  { %322 = vsyncadd [#allocation5], 4294967040 }
 0x137   :  { %259 = vsyncpa [#allocation4], 1 }
 0x138   :  { %260 = vsyncpa [#allocation5], 1 }

// kernel: run.1
= control target key start
LH: loop header
LB: loop body
LE: loop exit
PB: predicated region body
PF: predicated region fallthrough
CT: control target
= control target key end

     0   :  { %9 = vsyncpa [#allocation4], 0  ;;  %s372_s0 = inlined_call_operand.vmem [shape: f32[2,8,128], index: 0, kind: input, shape index: {}]   ;;  %s373_s1 = inlined_call_operand.hbm [shape: f32[128,256], index: 1, kind: input, shape index: {}]   ;;  %s374_s2 = inlined_call_operand.vmem [shape: f32[8,8], index: 2, kind: input, shape index: {}]   ;;  %s375_s3 = inlined_call_operand.vmem [shape: f32[8,8], index: 3, kind: input, shape index: {}]   ;;  %s376_s4 = inlined_call_operand.hbm [shape: f32[2,8,128], index: 4, kind: output, shape index: {}]  }
   0x1   :  { %10 = vsyncpa [#allocation5], 0  ;;  %s17_s17 = sshll.u32 %s373_s1, 4  ;;  %s323_s18 = smov [#allocation3]   ;;  %s18_s17 = int_to_ptr.hbm [resolvable:$true] %s17_s17 }
   0x2   :  { %s19_s19 = sshll.u32 %s323_s18, 4  ;;  %s324_s20 = smov 256   ;;  %s20_s19 = int_to_ptr.vmem [resolvable:$true] %s19_s19 }
   0x3   :  { %s325_s21 = smov 16  }
   0x4   :  { %25 = dma.hbm_to_vmem [thread:$0]  %s18_s17, 4096, %s20_s19, [#allocation4], %s324_s20, %s324_s20, %s325_s21  }
   0x5   :  { %319 = dma.done.wait [#allocation4], 4096  }
   0x6   :  { %320 = vsyncadd [#allocation4], 4294963200  ;;  %v74_v0 = vld [vmem:[#allocation3 + $0xf0] sm:$0xff]  ;;  %v75_v1 = vld [vmem:[#allocation3 + $0xf8] sm:$0xff]  ;;  %vm141_vm0 = vcmask 64512   ;;  %s248_s30 = sshll.u32 %s376_s4, 4  ;;  %s249_s30 = int_to_ptr.hbm [resolvable:$true] %s248_s30 }
   0x7   :  { %v72_v2 = vld [vmem:[#allocation3 + $0xe0] sm:$0xff]  ;;  %76 = vmatpush.msra.mxu0 %v74_v0  ;;  %99 = vmatpush.msra.mxu1 %v75_v1  ;;  %v73_v3 = vld [vmem:[#allocation3 + $0xe8] sm:$0xff]  ;;  %v70_v4 = vld [vmem:[#allocation3 + $0xd0] sm:$0xff]  ;;  %s327_s5 = smov 128   ;;  %s328_s6 = smov 8  }
   0x8   :  { %v71_v5 = vld [vmem:[#allocation3 + $0xd8] sm:$0xff]  ;;  %v68_v6 = vld [vmem:[#allocation3 + $0xc0] sm:$0xff]  ;;  %v69_v7 = vld [vmem:[#allocation3 + $0xc8] sm:$0xff] }
   0x9   :  { %77 = vmatpush.msra.mxu0 %v72_v2  ;;  %100 = vmatpush.msra.mxu1 %v73_v3  ;;  %v66_v8 = vld [vmem:[#allocation3 + $0xb0] sm:$0xff]  ;;  %v67_v9 = vld [vmem:[#allocation3 + $0xb8] sm:$0xff]  ;;  %v64_v10 = vld [vmem:[#allocation3 + $0xa0] sm:$0xff] }
   0xa   :  { %v65_v11 = vld [vmem:[#allocation3 + $0xa8] sm:$0xff]  ;;  %v62_v12 = vld [vmem:[#allocation3 + $0x90] sm:$0xff]  ;;  %v63_v13 = vld [vmem:[#allocation3 + $0x98] sm:$0xff] }
   0xb   :  { %78 = vmatpush.msra.mxu0 %v70_v4  ;;  %101 = vmatpush.msra.mxu1 %v71_v5  ;;  %v60_v14 = vld [vmem:[#allocation3 + $0x80] sm:$0xff]  ;;  %v61_v15 = vld [vmem:[#allocation3 + $0x88] sm:$0xff]  ;;  %v58_v16 = vld [vmem:[#allocation3 + $0x70] sm:$0xff] }
   0xc   :  { %v59_v17 = vld [vmem:[#allocation3 + $0x78] sm:$0xff]  ;;  %v56_v18 = vld [vmem:[#allocation3 + $0x60] sm:$0xff]  ;;  %v57_v19 = vld [vmem:[#allocation3 + $0x68] sm:$0xff] }
   0xd   :  { %79 = vmatpush.msra.mxu0 %v68_v6  ;;  %102 = vmatpush.msra.mxu1 %v69_v7  ;;  %v54_v20 = vld [vmem:[#allocation3 + $0x50] sm:$0xff]  ;;  %v55_v21 = vld [vmem:[#allocation3 + $0x58] sm:$0xff]  ;;  %v52_v22 = vld [vmem:[#allocation3 + $0x40] sm:$0xff] }
   0xe   :  { %v53_v23 = vld [vmem:[#allocation3 + $0x48] sm:$0xff]  ;;  %v50_v24 = vld [vmem:[#allocation3 + $0x30] sm:$0xff]  ;;  %v51_v25 = vld [vmem:[#allocation3 + $0x38] sm:$0xff] }
   0xf   :  { %80 = vmatpush.msra.mxu0 %v66_v8  ;;  %103 = vmatpush.msra.mxu1 %v67_v9  ;;  %v48_v26 = vld [vmem:[#allocation3 + $0x20] sm:$0xff]  ;;  %v49_v27 = vld [vmem:[#allocation3 + $0x28] sm:$0xff]  ;;  %v46_v28 = vld [vmem:[#allocation3 + $0x10] sm:$0xff] }
  0x10   :  { %v47_v29 = vld [vmem:[#allocation3 + $0x18] sm:$0xff]  ;;  %v44_v30 = vld [vmem:[#allocation3] sm:$0xff]  ;;  %v45_v31 = vld [vmem:[#allocation3 + $0x8] sm:$0xff] }
  0x11   :  { %81 = vmatpush.msra.mxu0 %v64_v10  ;;  %104 = vmatpush.msra.mxu1 %v65_v11  ;;  %v42_v32 = vld [vmem:[%s372_s0] sm:$0xff]  ;;  %v43_v33 = vld [vmem:[%s372_s0 + $0x8] sm:$0xff]  ;;  %s326_s0 = smov [#allocation6]  }
  0x12   :  { %v140_v34 = vld [vmem:[%s375_s3] sm:$0xff]  ;;  %s246_s3 = sshll.u32 %s326_s0, 4  ;;  %s247_s3 = int_to_ptr.vmem [resolvable:$true] %s246_s3 }
  0x13   :  { %82 = vmatpush.msra.mxu0 %v62_v12  ;;  %105 = vmatpush.msra.mxu1 %v63_v13  ;;  %v139_v35 = vld [vmem:[%s374_s2] sm:$0xff] }
  0x15   :  { %83 = vmatpush.msra.mxu0 %v60_v14  ;;  %106 = vmatpush.msra.mxu1 %v61_v15 }
  0x17   :  { %84 = vmatpush.msra.mxu0 %v58_v16  ;;  %107 = vmatpush.msra.mxu1 %v59_v17 }
  0x19   :  { %85 = vmatpush.msra.mxu0 %v56_v18  ;;  %108 = vmatpush.msra.mxu1 %v57_v19 }
  0x1b   :  { %86 = vmatpush.msra.mxu0 %v54_v20  ;;  %109 = vmatpush.msra.mxu1 %v55_v21 }
  0x1d   :  { %87 = vmatpush.msra.mxu0 %v52_v22  ;;  %110 = vmatpush.msra.mxu1 %v53_v23 }
  0x1f   :  { %88 = vmatpush.msra.mxu0 %v50_v24  ;;  %111 = vmatpush.msra.mxu1 %v51_v25 }
  0x21   :  { %89 = vmatpush.msra.mxu0 %v48_v26  ;;  %112 = vmatpush.msra.mxu1 %v49_v27 }
  0x23   :  { %90 = vmatpush.msra.mxu0 %v46_v28  ;;  %113 = vmatpush.msra.mxu1 %v47_v29 }
  0x25   :  { %91 = vmatpush.msra.mxu0 %v44_v30  ;;  %114 = vmatpush.msra.mxu1 %v45_v31 }
  0x26   :  { %92 = vmatmul.f32.vlgmr.msra.gmra.mxu0 %v42_v32  ;;  %115 = vmatmul.f32.vlgmr.msra.gmra.mxu1 %v42_v32 }
  0x2e   :  { %95 = vmatmul.f32.gmra.mxu0 %v43_v33  ;;  %118 = vmatmul.f32.gmra.mxu1 %v43_v33 }
  0xa3   :  { %v93_v36 = vpop.f32.mrf.mxu0  ;;  %v116_v37 = vpop.f32.mrf.mxu1 }
  0xa4   :  { %160 = vmatpush.msra.mxu2 %v116_v37  ;;  %183 = vmatpush.msra.mxu3 %v93_v36 }
  0xa5   :  { %261 = vmatmul.msk.f32.vlgmr.msra.gmra.mxu2 %vm141_vm0, %v140_v34  ;;  %262 = vmatmul.msk.f32.vlgmr.msra.gmra.mxu3 %vm141_vm0, %v139_v35 }
  0xab   :  { %v96_v38 = vpop.f32.mrf.mxu0  ;;  %v119_v39 = vpop.f32.mrf.mxu1 }
  0xac   :  { %212 = vmatpush.msrb.mxu2 %v119_v39  ;;  %235 = vmatpush.msrb.mxu3 %v96_v38 }
  0xad   :  { %263 = vmatmul.msk.f32.vlgmr.msrb.gmra.mxu2 %vm141_vm0, %v140_v34  ;;  %264 = vmatmul.msk.f32.vlgmr.msrb.gmra.mxu3 %vm141_vm0, %v139_v35 }
 0x128   :  { %v162_v40 = vpop.f32.mrf.mxu2  ;;  %v185_v41 = vpop.f32.mrf.mxu3 }
 0x129   :  { %v186_v42 = vadd.f32 %v185_v41, %v162_v40 }
 0x12b   :  { %188 = vst [vmem:[#allocation6] sm:$0xff] %v186_v42 }
 0x130   :  { %v214_v43 = vpop.f32.mrf.mxu2  ;;  %v237_v44 = vpop.f32.mrf.mxu3 }
 0x131   :  { %v238_v45 = vadd.f32 %v237_v44, %v214_v43 }
 0x133   :  { %241 = vst [vmem:[#allocation6 + $0x8] sm:$0xff] %v238_v45 }
 0x134   :  { %254 = dma.vmem_to_hbm [thread:$0]  %s247_s3, 256, %s249_s30, [#allocation5], %s327_s5, %s327_s5, %s328_s6  }
 0x135   :  { %321 = dma.done.wait [#allocation5], 256  }
 0x136   :  { %322 = vsyncadd [#allocation5], 4294967040 }
 0x137   :  { %259 = vsyncpa [#allocation4], 1 }
 0x138   :  { %260 = vsyncpa [#allocation5], 1 }

</bundles_post_ra>
